<compile_context>
chip_gen: v5e
topology: v5e:2x2
jax: 0.10.0
libtpu: 0.0.40
codegen_flags: <defaults>
</compile_context>

<pallas_src>
import functools

import jax
import jax.numpy as jnp
from jax.experimental import pallas as pl
from jax.experimental.pallas import tpu as pltpu


# ----------------------------------------------------------------------------
# Kernel A: up_mlp  (Conv1d k=1, no bias  ==  matmul) + folded BN + ReLU
# ----------------------------------------------------------------------------
def up_mlp_kernel(x1_ref, wup_ref, up_s_ref, up_b_ref, feat_ref):
    acc = jnp.dot(x1_ref[0], wup_ref[...],
                  preferred_element_type=jnp.float32)            # (tile, Cout) f32 acc
    acc = jnp.maximum(acc * up_s_ref[...] + up_b_ref[...], 0.0)
    feat_ref[0] = acc.astype(feat_ref.dtype)


# ----------------------------------------------------------------------------
# Kernel B: three_nn + three_interpolate + lateral_mlp + add, streamed over N
# ----------------------------------------------------------------------------
def interp_kernel(p2_ref, p1t_ref, feat_ref, x2_ref,
                  wlat_ref, lat_s_ref, lat_b_ref,
                  y_ref, dbest_ref, tbest_ref, fbest_ref,
                  *, feat_resident):
    n = pl.program_id(2)
    n_last = pl.num_programs(2) - 1
    M_t = p2_ref.shape[1]
    N_t = p1t_ref.shape[2]
    BIG = jnp.float32(1e30)

    # ---- init running best-3 (unordered slots) at the first N step
    @pl.when(n == 0)
    def _init():
        dbest_ref[...] = jnp.full(dbest_ref.shape, BIG, dbest_ref.dtype)
        fbest_ref[...] = jnp.zeros(fbest_ref.shape, fbest_ref.dtype)
        # Distinct negative arrival stamps -> deterministic fill order of the
        # still-empty (d=BIG) slots; real candidates use stamps >= 0.
        tbest_ref[0] = jnp.full((M_t, 1), -1.0, tbest_ref.dtype)
        tbest_ref[1] = jnp.full((M_t, 1), -2.0, tbest_ref.dtype)
        tbest_ref[2] = jnp.full((M_t, 1), -3.0, tbest_ref.dtype)

    # ---- squared pairwise distances for this (M_tile, N_tile) block (f32, VPU)
    p2 = p2_ref[0].astype(jnp.float32)                           # (M_t, 3)
    p1 = p1t_ref[0].astype(jnp.float32)                          # (3, N_t)
    dx = p2[:, 0:1] - p1[0:1, :]
    dy = p2[:, 1:2] - p1[1:2, :]
    dz = p2[:, 2:3] - p1[2:3, :]
    d = dx * dx + dy * dy + dz * dz                              # (M_t, N_t)

    # feat tile: VMEM-resident (dynamic index on the untiled N-step axis) or streamed.
    if feat_resident:
        feat = feat_ref[0, n]                                    # (N_t, Cout)
    else:
        feat = feat_ref[0, 0]                                    # (N_t, Cout)

    lane = jax.lax.broadcasted_iota(jnp.int32, (M_t, N_t), 1)

    # Running best-3 slots: distance (col), arrival stamp (col), feature row (wide).
    d_s = [dbest_ref[0], dbest_ref[1], dbest_ref[2]]
    t_s = [tbest_ref[0], tbest_ref[1], tbest_ref[2]]
    f_s = [fbest_ref[0], fbest_ref[1], fbest_ref[2]]

    n_f = n.astype(jnp.float32)
    dw = d
    for pick in range(3):
        # local minimum of this tile; first (lowest-index) lane achieving it
        e = jnp.min(dw, axis=1, keepdims=True)                   # (M_t, 1)
        first = jnp.min(jnp.where(dw == e, lane, N_t),
                        axis=1, keepdims=True)
        hit = lane == first                                      # (M_t, N_t) one-hot
        g = jnp.dot(hit.astype(feat.dtype), feat,
                    preferred_element_type=jnp.float32)          # (M_t, Cout) gathered row
        dw = jnp.where(hit, BIG, dw)                             # mask for the next pick

        # --- unsorted "replace current max slot" merge (tie-exact vs top_k):
        # candidates arrive in nondecreasing (distance, global index) order per
        # row, so strict '<' rejects equal-distance latecomers, and among tied
        # slot maxima the most recently inserted (largest stamp) one is evicted.
        stamp = n_f * 3.0 + jnp.float32(pick)                    # monotone arrival stamp
        maxd = jnp.maximum(d_s[0], jnp.maximum(d_s[1], d_s[2]))  # (M_t, 1)
        accept = e < maxd
        is_max = [ds_ == maxd for ds_ in d_s]
        tmask = [jnp.where(im, ts_, jnp.float32(-4.0))
                 for im, ts_ in zip(is_max, t_s)]
        maxt = jnp.maximum(tmask[0], jnp.maximum(tmask[1], tmask[2]))
        for s in range(3):
            ev = accept & is_max[s] & (tmask[s] == maxt)         # (M_t, 1) narrow mask
            d_s[s] = jnp.where(ev, e, d_s[s])
            t_s[s] = jnp.where(ev, stamp, t_s[s])
            f_s[s] = jnp.where(ev, g, f_s[s])                    # 1 wide select per slot

    # Persist the running state for the next N step (dead on the last step).
    @pl.when(n < n_last)
    def _save():
        for s in range(3):
            dbest_ref[s] = d_s[s]
            tbest_ref[s] = t_s[s]
            fbest_ref[s] = f_s[s]

    # ---- after the last N step: weights, interpolation, lateral MLP, add
    @pl.when(n == n_last)
    def _finalize():
        eps = jnp.float32(1e-8)
        r = [1.0 / (d_s[s] + eps) for s in range(3)]             # (M_t, 1) columns
        inv = 1.0 / (r[0] + r[1] + r[2])                         # column reciprocal
        interp = ((r[0] * inv) * f_s[0] + (r[1] * inv) * f_s[1]
                  + (r[2] * inv) * f_s[2])                       # wide FMAs, no wide divide

        lat = jnp.dot(x2_ref[0], wlat_ref[...],
                      preferred_element_type=jnp.float32)        # (M_t, Cout)
        lat = jnp.maximum(lat * lat_s_ref[...] + lat_b_ref[...], 0.0)

        y_ref[0] = (interp + lat).astype(y_ref.dtype)


# ----------------------------------------------------------------------------
# Wrapper
# ----------------------------------------------------------------------------
def _round_up(x, m):
    return (x + m - 1) // m * m


def transition_up(x1, p1, x2, p2,
                  w_up, up_scale, up_shift,
                  w_lat, lat_scale, lat_shift,
                  *, m_tile=256, n_tile=512,
                  mxu_dtype=jnp.bfloat16,
                  max_resident_feat_bytes=12 * 1024 * 1024,
                  vmem_limit_bytes=40 * 1024 * 1024):
    """x1:(B,N,Cin) p1:(B,N,3) x2:(B,M,Cout) p2:(B,M,3) -> (y:(B,M,Cout), p2)."""
    B, N, Cin = x1.shape
    _, M, Cout = x2.shape

    if mxu_dtype is None:
        mxu_dtype = x1.dtype

    # Clamp tiles to the (128-rounded) problem size so small inputs do not over-pad.
    n_tile = _round_up(min(n_tile, _round_up(N, 128)), 128)
    m_tile = _round_up(min(m_tile, _round_up(M, 128)), 128)

    N_pad = _round_up(N, n_tile)
    M_pad = _round_up(M, m_tile)

    if N_pad != N:
        x1 = jnp.pad(x1, ((0, 0), (0, N_pad - N), (0, 0)))
        # Huge coordinates: padded source points can never be 3-NN of real queries.
        p1 = jnp.pad(p1, ((0, 0), (0, N_pad - N), (0, 0)), constant_values=1e9)
    if M_pad != M:
        x2_p = jnp.pad(x2, ((0, 0), (0, M_pad - M), (0, 0)))
        p2_p = jnp.pad(p2, ((0, 0), (0, M_pad - M), (0, 0)))
    else:
        x2_p, p2_p = x2, p2

    # MXU operands in the compute dtype (bf16 by default); BN scale/shift and all
    # distance / weight math stay f32.
    x1_m = x1.astype(mxu_dtype)
    w_up_m = w_up.astype(mxu_dtype)
    x2_m = x2_p.astype(mxu_dtype)
    w_lat_m = w_lat.astype(mxu_dtype)
    up_s = jnp.asarray(up_scale, jnp.float32).reshape(1, Cout)
    up_b = jnp.asarray(up_shift, jnp.float32).reshape(1, Cout)
    lat_s = jnp.asarray(lat_scale, jnp.float32).reshape(1, Cout)
    lat_b = jnp.asarray(lat_shift, jnp.float32).reshape(1, Cout)

    p1t = jnp.transpose(p1, (0, 2, 1))                           # (B, 3, N_pad)

    cp_a = pltpu.CompilerParams(dimension_semantics=("parallel", "parallel"),
                                vmem_limit_bytes=vmem_limit_bytes)
    cp_b = pltpu.CompilerParams(
        dimension_semantics=("parallel", "parallel", "arbitrary"),
        vmem_limit_bytes=vmem_limit_bytes)

    # ---- kernel A: memory-bound -> biggest row tile (<=1024) dividing N_pad.
    a_tile = n_tile
    for mult in (8, 4, 2):
        t = n_tile * mult
        if t <= 1024 and N_pad % t == 0:
            a_tile = t
            break

    feat = pl.pallas_call(
        up_mlp_kernel,
        out_shape=jax.ShapeDtypeStruct((B, N_pad, Cout), mxu_dtype),
        grid_spec=pltpu.PrefetchScalarGridSpec(
            num_scalar_prefetch=0,
            grid=(B, N_pad // a_tile),
            in_specs=[
                pl.BlockSpec((1, a_tile, Cin), lambda b, n: (b, n, 0)),
                pl.BlockSpec((Cin, Cout), lambda b, n: (0, 0)),
                pl.BlockSpec((1, Cout), lambda b, n: (0, 0)),
                pl.BlockSpec((1, Cout), lambda b, n: (0, 0)),
            ],
            out_specs=pl.BlockSpec((1, a_tile, Cout), lambda b, n: (b, n, 0)),
        ),
        compiler_params=cp_a,
    )(x1_m, w_up_m, up_s, up_b)

    # ---- kernel B: 3-NN + interpolation + lateral MLP + add
    n_tiles = N_pad // n_tile
    feat4 = feat.reshape(B, n_tiles, n_tile, Cout)
    feat_bytes = N_pad * Cout * feat.dtype.itemsize
    feat_resident = feat_bytes <= max_resident_feat_bytes
    if feat_resident:
        # Whole per-batch feat lives in VMEM; re-read from HBM only when b changes.
        feat_spec = pl.BlockSpec((1, n_tiles, n_tile, Cout),
                                 lambda b, m, n: (b, 0, 0, 0))
    else:
        # Too big for VMEM: stream one N tile per step.
        feat_spec = pl.BlockSpec((1, 1, n_tile, Cout),
                                 lambda b, m, n: (b, n, 0, 0))

    y_pad = pl.pallas_call(
        functools.partial(interp_kernel, feat_resident=feat_resident),
        out_shape=jax.ShapeDtypeStruct((B, M_pad, Cout), x2.dtype),
        grid_spec=pltpu.PrefetchScalarGridSpec(
            num_scalar_prefetch=0,
            grid=(B, M_pad // m_tile, n_tiles),
            in_specs=[
                pl.BlockSpec((1, m_tile, 3), lambda b, m, n: (b, m, 0)),      # p2
                pl.BlockSpec((1, 3, n_tile), lambda b, m, n: (b, 0, n)),      # p1^T
                feat_spec,                                                    # feat
                pl.BlockSpec((1, m_tile, Cout), lambda b, m, n: (b, m, 0)),   # x2
                pl.BlockSpec((Cout, Cout), lambda b, m, n: (0, 0)),           # W_lat
                pl.BlockSpec((1, Cout), lambda b, m, n: (0, 0)),              # lat scale
                pl.BlockSpec((1, Cout), lambda b, m, n: (0, 0)),              # lat shift
            ],
            out_specs=pl.BlockSpec((1, m_tile, Cout), lambda b, m, n: (b, m, 0)),
            scratch_shapes=[
                pltpu.VMEM((3, m_tile, 1), jnp.float32),      # best-3 dist^2
                pltpu.VMEM((3, m_tile, 1), jnp.float32),      # best-3 arrival stamps
                pltpu.VMEM((3, m_tile, Cout), jnp.float32),   # best-3 feature rows
            ],
        ),
        compiler_params=cp_b,
    )(p2_p, p1t, feat4, x2_m, w_lat_m, lat_s, lat_b)

    return y_pad[:, :M, :], p2


# ----------------------------------------------------------------------------
# Pure-JAX reference
# ----------------------------------------------------------------------------
def transition_up_reference(x1, p1, x2, p2,
                            w_up, up_scale, up_shift,
                            w_lat, lat_scale, lat_shift):
    hi = jax.lax.Precision.HIGHEST
    feat = jnp.maximum(
        jnp.einsum('bnc,cd->bnd', x1, w_up, precision=hi) * up_scale + up_shift, 0.0)
    d = jnp.sum((p2[:, :, None, :] - p1[:, None, :, :]) ** 2, axis=-1)     # (B,M,N)
    neg_vals, idx = jax.lax.top_k(-d, 3)                                   # 3 smallest
    dist = -neg_vals
    recip = 1.0 / (dist + 1e-8)
    weight = recip / jnp.sum(recip, axis=-1, keepdims=True)                # (B,M,3)
    gathered = jax.vmap(lambda f, i: f[i])(feat, idx)                      # (B,M,3,Cout)
    interp = jnp.sum(weight[..., None] * gathered, axis=2)                 # (B,M,Cout)
    lat = jnp.maximum(
        jnp.einsum('bmc,cd->bmd', x2, w_lat, precision=hi) * lat_scale + lat_shift, 0.0)
    return interp + lat, p2


if __name__ == "__main__":
    # Shapes chosen to exercise padding, multiple M tiles and multiple N steps.
    B, N, M, Cin, Cout = 2, 320, 512, 64, 128

    key = jax.random.PRNGKey(0)
    ks = jax.random.split(key, 14)
    x1 = jax.random.normal(ks[0], (B, N, Cin), jnp.float32)
    p1 = jax.random.normal(ks[1], (B, N, 3), jnp.float32)
    x2 = jax.random.normal(ks[2], (B, M, Cout), jnp.float32)
    p2 = jax.random.normal(ks[3], (B, M, 3), jnp.float32)

    # Conv1d weights: PyTorch shape (Cout, Cin, 1) -> (Cin, Cout) for channels-last matmul.
    w_up = (jax.random.normal(ks[4], (Cout, Cin), jnp.float32) * 0.1).T
    w_lat = (jax.random.normal(ks[5], (Cout, Cout), jnp.float32) * 0.1).T

    # BatchNorm1d (eval mode) parameters, folded to per-channel scale/shift.
    eps = 1e-5
    up_gamma = jax.random.uniform(ks[6], (Cout,), minval=0.5, maxval=1.5)
    up_beta = jax.random.normal(ks[7], (Cout,)) * 0.1
    up_mean = jax.random.normal(ks[8], (Cout,)) * 0.1
    up_var = jax.random.uniform(ks[9], (Cout,), minval=0.5, maxval=1.5)
    lat_gamma = jax.random.uniform(ks[10], (Cout,), minval=0.5, maxval=1.5)
    lat_beta = jax.random.normal(ks[11], (Cout,)) * 0.1
    lat_mean = jax.random.normal(ks[12], (Cout,)) * 0.1
    lat_var = jax.random.uniform(ks[13], (Cout,), minval=0.5, maxval=1.5)

    up_scale = (up_gamma / jnp.sqrt(up_var + eps)).reshape(1, Cout)
    up_shift = (up_beta - up_mean * up_gamma / jnp.sqrt(up_var + eps)).reshape(1, Cout)
    lat_scale = (lat_gamma / jnp.sqrt(lat_var + eps)).reshape(1, Cout)
    lat_shift = (lat_beta - lat_mean * lat_gamma / jnp.sqrt(lat_var + eps)).reshape(1, Cout)

    args = (x1, p1, x2, p2, w_up, up_scale, up_shift, w_lat, lat_scale, lat_shift)
    y_ref, _ = transition_up_reference(*args)

    # 1) Defaults: bf16 MXU/feat, large tiles, VMEM-resident feat (loose tolerance
    #    accounts for deliberate bf16 quantization of the MXU operands).
    y1, p2_out = transition_up(*args)
    y1 = jax.block_until_ready(y1)
    assert y1.shape == (B, M, Cout)
    assert jnp.allclose(y1, y_ref, atol=5e-2, rtol=5e-2), "bf16/resident mismatch"
    assert jnp.array_equal(p2_out, p2)

    # 2) f32 MXU, resident feat, 2 N steps + 2 M tiles: tight check of the
    #    streamed best-3 merge (incl. source-point padding).
    y2, _ = transition_up(*args, m_tile=256, n_tile=256, mxu_dtype=jnp.float32)
    y2 = jax.block_until_ready(y2)
    assert jnp.allclose(y2, y_ref, atol=1e-3, rtol=1e-3), "f32/resident mismatch"

    # 3) bf16, small tiles, HBM-streamed feat path (forced), 3 N steps / 4 M tiles.
    y3, _ = transition_up(*args, m_tile=128, n_tile=128, max_resident_feat_bytes=0)
    y3 = jax.block_until_ready(y3)
    assert jnp.allclose(y3, y_ref, atol=5e-2, rtol=5e-2), "bf16/streamed mismatch"

    print("KERNEL_OK")
</pallas_src>

<mosaic_0001>
module attributes {stable_mosaic.version = 11 : i64} {
  func.func @up_mlp_kernel(%arg0: i32, %arg1: i32, %arg2: memref<1x384x64xbf16, #tpu.memory_space<vmem>>, %arg3: memref<64x128xbf16, #tpu.memory_space<vmem>>, %arg4: memref<1x128xf32, #tpu.memory_space<vmem>>, %arg5: memref<1x128xf32, #tpu.memory_space<vmem>>, %arg6: memref<1x384x128xbf16, #tpu.memory_space<vmem>>) attributes {dimension_semantics = [#tpu.dimension_semantics<parallel>, #tpu.dimension_semantics<parallel>], iteration_bounds = array<i64: 2, 1>, scalar_prefetch = 0 : i64, scratch_operands = 0 : i64, tpu.core_type = #tpu.core_type<tc>, window_params = [{transform_indices = @transform_0, window_bounds = array<i64: 1, 384, 64>}, {pipeline_mode = #tpu.pipeline_mode<synchronous>, transform_indices = @transform_1, window_bounds = array<i64: 64, 128>}, {pipeline_mode = #tpu.pipeline_mode<synchronous>, transform_indices = @transform_2, window_bounds = array<i64: 1, 128>}, {pipeline_mode = #tpu.pipeline_mode<synchronous>, transform_indices = @transform_3, window_bounds = array<i64: 1, 128>}, {transform_indices = @transform_4, window_bounds = array<i64: 1, 384, 128>}]} {
    %c0 = arith.constant 0 : index
    %c0_0 = arith.constant 0 : index
    %c0_1 = arith.constant 0 : index
    %0 = vector.load %arg2[%c0, %c0_0, %c0_1] : memref<1x384x64xbf16, #tpu.memory_space<vmem>>, vector<1x384x64xbf16>
    %1 = vector.shape_cast %0 : vector<1x384x64xbf16> to vector<384x64xbf16>
    %c0_2 = arith.constant 0 : index
    %c0_3 = arith.constant 0 : index
    %2 = vector.load %arg3[%c0_2, %c0_3] : memref<64x128xbf16, #tpu.memory_space<vmem>>, vector<64x128xbf16>
    %cst = arith.constant dense<0.000000e+00> : vector<384x128xf32>
    %3 = tpu.matmul %1, %2, %cst {dimension_numbers = #tpu.dot_dimension_numbers<[1], [0], [0], [1], [0, 0, 1, 1], [], []>} : vector<384x64xbf16>, vector<64x128xbf16>, vector<384x128xf32> -> vector<384x128xf32>
    %c0_4 = arith.constant 0 : index
    %c0_5 = arith.constant 0 : index
    %4 = vector.load %arg4[%c0_4, %c0_5] : memref<1x128xf32, #tpu.memory_space<vmem>>, vector<1x128xf32>
    %5 = vector.broadcast %4 : vector<1x128xf32> to vector<384x128xf32>
    %6 = arith.mulf %3, %5 : vector<384x128xf32>
    %c0_6 = arith.constant 0 : index
    %c0_7 = arith.constant 0 : index
    %7 = vector.load %arg5[%c0_6, %c0_7] : memref<1x128xf32, #tpu.memory_space<vmem>>, vector<1x128xf32>
    %8 = vector.broadcast %7 : vector<1x128xf32> to vector<384x128xf32>
    %9 = arith.addf %6, %8 : vector<384x128xf32>
    %cst_8 = arith.constant 0.000000e+00 : f32
    %10 = vector.broadcast %cst_8 : f32 to vector<384x128xf32>
    %11 = arith.maximumf %9, %10 : vector<384x128xf32>
    %12 = arith.truncf %11 : vector<384x128xf32> to vector<384x128xbf16>
    %c0_9 = arith.constant 0 : index
    %c0_10 = arith.constant 0 : index
    %c0_11 = arith.constant 0 : index
    %13 = vector.load %arg6[%c0_9, %c0_10, %c0_11] : memref<1x384x128xbf16, #tpu.memory_space<vmem>>, vector<1x384x128xbf16>
    %14 = vector.shape_cast %13 : vector<1x384x128xbf16> to vector<384x128xbf16>
    %15 = vector.shape_cast %12 : vector<384x128xbf16> to vector<1x384x128xbf16>
    tpu.vector_store %arg6[%c0_9, %c0_10, %c0_11], %15 {strides = array<i32>} : memref<1x384x128xbf16, #tpu.memory_space<vmem>>, vector<1x384x128xbf16>,
    return
  }
  func.func @transform_0(%arg0: i32, %arg1: i32) -> (i32, i32, i32) {
    %c0_i32 = arith.constant 0 : i32
    %c0_i32_0 = arith.constant 0 : i32
    return %arg0, %arg1, %c0_i32 : i32, i32, i32
  }
  func.func @transform_1(%arg0: i32, %arg1: i32) -> (i32, i32) {
    %c0_i32 = arith.constant 0 : i32
    %c0_i32_0 = arith.constant 0 : i32
    %c0_i32_1 = arith.constant 0 : i32
    return %c0_i32, %c0_i32_0 : i32, i32
  }
  func.func @transform_2(%arg0: i32, %arg1: i32) -> (i32, i32) {
    %c0_i32 = arith.constant 0 : i32
    %c0_i32_0 = arith.constant 0 : i32
    %c0_i32_1 = arith.constant 0 : i32
    return %c0_i32, %c0_i32_0 : i32, i32
  }
  func.func @transform_3(%arg0: i32, %arg1: i32) -> (i32, i32) {
    %c0_i32 = arith.constant 0 : i32
    %c0_i32_0 = arith.constant 0 : i32
    %c0_i32_1 = arith.constant 0 : i32
    return %c0_i32, %c0_i32_0 : i32, i32
  }
  func.func @transform_4(%arg0: i32, %arg1: i32) -> (i32, i32, i32) {
    %c0_i32 = arith.constant 0 : i32
    %c0_i32_0 = arith.constant 0 : i32
    return %arg0, %arg1, %c0_i32 : i32, i32, i32
  }
}

</mosaic_0001>

<bundles_post_ra>
// kernel: tpu_custom_call.1
= control target key start
LH: loop header
LB: loop body
LE: loop exit
PB: predicated region body
PF: predicated region fallthrough
CT: control target
= control target key end

     0   :  { %9 = vsyncpa [#allocation3], 0  ;;  %s1768_s0 = inlined_call_operand.vmem [shape: bf16[2,384,64], index: 0, kind: input, shape index: {}]   ;;  %s1769_s1 = inlined_call_operand.vmem [shape: bf16[64,128], index: 1, kind: input, shape index: {}]   ;;  %s1770_s2 = inlined_call_operand.vmem [shape: f32[1,128], index: 2, kind: input, shape index: {}]   ;;  %s1771_s3 = inlined_call_operand.vmem [shape: f32[1,128], index: 3, kind: input, shape index: {}]   ;;  %s1772_s4 = inlined_call_operand.hbm [shape: bf16[2,384,128], index: 4, kind: output, shape index: {}]  }
   0x1   :  { %11 = vsyncpa [#allocation3 + $0x1], 0  ;;  %s1472_s15 = smov 0   ;;  %s1474_s16 = smov 0  }
   0x2   :  { %s1476_s17 = smov 0   ;;  %s1478_s18 = smov 0  }
   0x3   :  { %s1480_s19 = smov 0   ;;  %s1482_s20 = smov 0  }
   0x4 LB: > { %s975_s21 = sadd.s32 4294967295, %s1443_s20   ;;  %s976_s22 = sadd.s32 4294967294, %s1443_s20   ;;  %s1443_s20 = sphi %s1482_s20, %s17_s20   ;;  %s1439_s19 = sphi %s1480_s19, %s1779_s19   ;;  %s1435_s18 = sphi %s1478_s18, %s1778_s18   ;;  %s1431_s17 = sphi %s1476_s17, %s1777_s17   ;;  %s1427_s16 = sphi %s1474_s16, %s1776_s16   ;;  %s1423_s15 = sphi %s1472_s15, %s1775_s15  }
   0x5   : > { %s29_s23 = sadd.s32 1, %s1439_s19  ;;  %s129_s24 = sadd.s32 1, %s1431_s17 }
   0x6   : > { %p31_p0 = scmp.ge.s32.totalorder %s29_s23, 2  ;;  %p139_p1 = scmp.ne.s32.totalorder %s1431_s17, %s1427_s16 }
   0x7   : > { %p140_p2 = scmp.eq.s32.totalorder %s975_s21, 1  ;;  %p145_p3 = scmp.ne.s32.totalorder %s1427_s16, %s1423_s15 }
   0x8   : > { %s1781_s23 = smov (%p31_p0, %s29_s23), 0  ;;  %p146_p5 = scmp.eq.s32.totalorder %s976_s22, 1 }
   0x9   : > { %p1512_p4 = por %p140_p2, %p139_p1  ;;  %s124_s26 = ssub.s32 %s1439_s19, %s1781_s23 }
   0xa   : > { %p979_p6 = scmp.ge.s32.totalorder %s1443_s20, 1  ;;  %p127_p7 = scmp.eq.s32.totalorder %s124_s26, 0 }
   0xb   : > { %p1519_p8 = por %p146_p5, %p145_p3  ;;  %p186_p9 = scmp.lt.s32.totalorder %s1443_s20, 3 }
   0xc   : > { %s1525_s28 = scalar_select %p127_p7, %s1431_s17, %s129_s24  }
   0xd   : > { %p187_p10 = pnand %p979_p6, %p186_p9 }
   0xe   : > { %p217_p11 = scmp.lt.s32.totalorder (!%p187_p10), %s1435_s18, 1  ;;  %s213_s30 = sand.u32 (!%p187_p10), 1, %s1427_s16  }
   0xf   : > { %190 = sbr.rel (%p187_p10) target bundleno = 270 (0x10e), region = 36  ;;  %s879_s12 = scalar_lea.sflag (!%p187_p10), [#allocation3], %s213_s30 }
  0x10   : > { %s1303_s5 = smul.u32 (!%p187_p10), 192, %s213_s30  ;;  %s1385_s24 = scalar_lea.hbm (!%p187_p10), %s1772_s4, 384 }
  0x12   : > { %s1621_s6 = scalar_lea.vmem (!%p187_p10), [#allocation2], %s1303_s5 }
  0x14   : > { %v1147_v0 = vld [vmem:[%s1769_s1 + $0x18] sm:$0xff]  ;;  %v1146_v1 = vld [vmem:[%s1769_s1 + $0x10] sm:$0xff]  ;;  %s218_s7 = scalar_select %p217_p11, %s1435_s18, 1  ;;  %v1145_v2 = vld [vmem:[%s1769_s1 + $0x8] sm:$0xff]  ;;  %vm428_vm0 = vcmask 523264  }
  0x15   : > { %505 = vmatpush.bf16.msra.mxu0 %v1147_v0  ;;  %1291 = vmatpush.bf16.msra.mxu1 %v1147_v0  ;;  %v1144_v3 = vld [vmem:[%s1769_s1] sm:$0xff] }
  0x16   : > { %1292 = vmatpush.bf16.msra.mxu2 %v1147_v0  ;;  %1293 = vmatpush.bf16.msra.mxu3 %v1147_v0  ;;  %s1304_s10 = smul.u32 192, %s218_s7  ;;  %v1597_v30 = vld [vmem:[%s1770_s2] ss:$0 sm:$0xff] }
  0x17   : > { %v1603_v32 = vld [vmem:[%s1771_s3] ss:$0 sm:$0xff]  ;;  %s1305_s7 = smul.u32 192, %s1435_s18 }
  0x18   : > { %s1544_s21 = scalar_lea.vmem %s1768_s0, %s1304_s10  ;;  %s893_s10 = sshll.u32 %s1621_s6, 4  ;;  %s894_s10 = int_to_ptr.vmem [resolvable:$true] %s893_s10 }
  0x19   : > { %506 = vmatpush.bf16.msra.mxu0 %v1146_v1  ;;  %1294 = vmatpush.bf16.msra.mxu1 %v1146_v1  ;;  %v1120_v4 = vld [vmem:[%s1544_s21] sm:$0xff]  ;;  %v1126_v5 = vld [vmem:[%s1544_s21 + $0x30] sm:$0xff]  ;;  %v1121_v8 = vld [vmem:[%s1544_s21 + $0x8] sm:$0xff]  ;;  %s892_s18 = scalar_lea.hbm %s1772_s4, %s1305_s7 }
  0x1a   : > { %1295 = vmatpush.bf16.msra.mxu2 %v1146_v1  ;;  %1296 = vmatpush.bf16.msra.mxu3 %v1146_v1  ;;  %v1132_v6 = vld [vmem:[%s1544_s21 + $0x60] sm:$0xff]  ;;  %v1138_v7 = vld [vmem:[%s1544_s21 + $0x90] sm:$0xff]  ;;  %v1127_v9 = vld [vmem:[%s1544_s21 + $0x38] sm:$0xff]  ;;  %s895_s11 = sshll.u32 %s892_s18, 4  ;;  %s896_s11 = int_to_ptr.hbm [resolvable:$true] %s895_s11 }
  0x1b   : > { %v1133_v10 = vld [vmem:[%s1544_s21 + $0x68] sm:$0xff]  ;;  %v1139_v11 = vld [vmem:[%s1544_s21 + $0x98] sm:$0xff]  ;;  %v1122_v12 = vld [vmem:[%s1544_s21 + $0x10] sm:$0xff]  ;;  %s1379_s13 = sshra.s32 %s896_s11, 4  ;;  %s1380_s13 = int_to_ptr.hbm [resolvable:$true] %s1379_s13 }
  0x1c   : > { %v1128_v13 = vld [vmem:[%s1544_s21 + $0x40] sm:$0xff]  ;;  %v1134_v14 = vld [vmem:[%s1544_s21 + $0x70] sm:$0xff]  ;;  %v1123_v16 = vld [vmem:[%s1544_s21 + $0x18] sm:$0xff]  ;;  %s1381_s14 = scalar_lea.hbm %s1380_s13, 192  ;;  %p1386_p1 = scmp.lt.s32.totalorder %s1380_s13, %s1772_s4 }
  0x1d   : > { %507 = vmatpush.bf16.msra.mxu0 %v1145_v2  ;;  %1297 = vmatpush.bf16.msra.mxu1 %v1145_v2  ;;  %v1140_v15 = vld [vmem:[%s1544_s21 + $0xa0] sm:$0xff]  ;;  %v1129_v17 = vld [vmem:[%s1544_s21 + $0x48] sm:$0xff]  ;;  %v1135_v18 = vld [vmem:[%s1544_s21 + $0x78] sm:$0xff]  ;;  %p1382_p12 = scmp.ne.s32.totalorder %s1380_s13, %s1381_s14  ;;  %p1387_p2 = scmp.lt.s32.totalorder %s1385_s24, %s1381_s14 }
  0x1e   : > { %1298 = vmatpush.bf16.msra.mxu2 %v1145_v2  ;;  %1299 = vmatpush.bf16.msra.mxu3 %v1145_v2  ;;  %v1141_v19 = vld [vmem:[%s1544_s21 + $0xa8] sm:$0xff]  ;;  %v1124_v20 = vld [vmem:[%s1544_s21 + $0x20] sm:$0xff]  ;;  %v1130_v21 = vld [vmem:[%s1544_s21 + $0x50] sm:$0xff] }
  0x1f   : > { %v1136_v22 = vld [vmem:[%s1544_s21 + $0x80] sm:$0xff]  ;;  %v1142_v23 = vld [vmem:[%s1544_s21 + $0xb0] sm:$0xff]  ;;  %v1125_v24 = vld [vmem:[%s1544_s21 + $0x28] sm:$0xff]  ;;  %p1383_p13 = pnand %p1382_p12, %p1512_p4  ;;  %p1388_p3 = por %p1387_p2, %p1386_p1 }
  0x20   : > { %v1131_v25 = vld [vmem:[%s1544_s21 + $0x58] sm:$0xff]  ;;  %v1137_v26 = vld [vmem:[%s1544_s21 + $0x88] sm:$0xff] }
  0x21   : > { %508 = vmatpush.bf16.msra.mxu0 %v1144_v3  ;;  %1300 = vmatpush.bf16.msra.mxu1 %v1144_v3  ;;  %v1143_v27 = vld [vmem:[%s1544_s21 + $0xb8] sm:$0xff]  ;;  %p1384_p0 = pneg %p1383_p13 }
  0x22   : > { %1301 = vmatpush.bf16.msra.mxu2 %v1144_v3  ;;  %1302 = vmatpush.bf16.msra.mxu3 %v1144_v3 }
  0x23   : > { %p1389_p5 = pnand %p1388_p3, %p1384_p0 }
  0x24   : > { %1093 = vmatmul.msk.bf16.vlgmr.msra.gmra.mxu0 %vm428_vm0, %v1120_v4  ;;  %1099 = vmatmul.msk.bf16.vlgmr.msra.gmra.mxu1 %vm428_vm0, %v1126_v5 }
  0x25   : > { %1105 = vmatmul.msk.bf16.vlgmr.msra.gmra.mxu2 %vm428_vm0, %v1132_v6  ;;  %1111 = vmatmul.msk.bf16.vlgmr.msra.gmra.mxu3 %vm428_vm0, %v1138_v7 }
  0x34   : > { %1094 = vmatmul.msk.bf16.gmra.mxu0 %vm428_vm0, %v1121_v8  ;;  %1100 = vmatmul.msk.bf16.gmra.mxu1 %vm428_vm0, %v1127_v9 }
  0x35   : > { %1106 = vmatmul.msk.bf16.gmra.mxu2 %vm428_vm0, %v1133_v10  ;;  %1112 = vmatmul.msk.bf16.gmra.mxu3 %vm428_vm0, %v1139_v11 }
  0x44   : > { %1095 = vmatmul.msk.bf16.gmra.mxu0 %vm428_vm0, %v1122_v12  ;;  %1101 = vmatmul.msk.bf16.gmra.mxu1 %vm428_vm0, %v1128_v13 }
  0x45   : > { %1107 = vmatmul.msk.bf16.gmra.mxu2 %vm428_vm0, %v1134_v14  ;;  %1113 = vmatmul.msk.bf16.gmra.mxu3 %vm428_vm0, %v1140_v15 }
  0x54   : > { %1096 = vmatmul.msk.bf16.gmra.mxu0 %vm428_vm0, %v1123_v16  ;;  %1102 = vmatmul.msk.bf16.gmra.mxu1 %vm428_vm0, %v1129_v17 }
  0x55   : > { %1108 = vmatmul.msk.bf16.gmra.mxu2 %vm428_vm0, %v1135_v18  ;;  %1114 = vmatmul.msk.bf16.gmra.mxu3 %vm428_vm0, %v1141_v19 }
  0x64   : > { %1097 = vmatmul.msk.bf16.gmra.mxu0 %vm428_vm0, %v1124_v20  ;;  %1103 = vmatmul.msk.bf16.gmra.mxu1 %vm428_vm0, %v1130_v21 }
  0x65   : > { %1109 = vmatmul.msk.bf16.gmra.mxu2 %vm428_vm0, %v1136_v22  ;;  %1115 = vmatmul.msk.bf16.gmra.mxu3 %vm428_vm0, %v1142_v23 }
  0x74   : > { %1098 = vmatmul.msk.bf16.gmra.mxu0 %vm428_vm0, %v1125_v24  ;;  %1104 = vmatmul.msk.bf16.gmra.mxu1 %vm428_vm0, %v1131_v25 }
  0x75   : > { %1110 = vmatmul.msk.bf16.gmra.mxu2 %vm428_vm0, %v1137_v26  ;;  %1116 = vmatmul.msk.bf16.gmra.mxu3 %vm428_vm0, %v1143_v27 }
  0xa1   : > { %v510_v28 = vpop.f32.mrf.mxu0  ;;  %v540_v29 = vpop.f32.mrf.mxu1 }
  0xa2   : > { %v634_v31 = vmul.f32 %v1597_v30, %v510_v28  ;;  %v646_v33 = vmul.f32 %v1597_v30, %v540_v29 }
  0xa4   : > { %v686_v38 = vadd.f32 %v1603_v32, %v634_v31  ;;  %v698_v39 = vadd.f32 %v1603_v32, %v646_v33 }
  0xa6   : > { %v734_v46 = vmax.f32 %v686_v38, 0.0  ;;  %v746_v47 = vmax.f32 %v698_v39, 0.0 }
  0xa8   : > { %v570_v34 = vpop.f32.mrf.mxu2  ;;  %v600_v35 = vpop.f32.mrf.mxu3 }
  0xa9   : > { %v512_v36 = vpop.f32.mrf.mxu0  ;;  %v542_v37 = vpop.f32.mrf.mxu1  ;;  %v658_v44 = vmul.f32 %v1597_v30, %v570_v34  ;;  %v670_v45 = vmul.f32 %v1597_v30, %v600_v35 }
  0xaa   : > { %v635_v40 = vmul.f32 %v1597_v30, %v512_v36  ;;  %v647_v41 = vmul.f32 %v1597_v30, %v542_v37 }
  0xab   : > { %v710_v54 = vadd.f32 %v1603_v32, %v658_v44  ;;  %v722_v55 = vadd.f32 %v1603_v32, %v670_v45 }
  0xac   : > { %v687_v42 = vadd.f32 %v1603_v32, %v635_v40  ;;  %v699_v43 = vadd.f32 %v1603_v32, %v647_v41 }
  0xad   : > { %v758_v62 = vmax.f32 %v710_v54, 0.0  ;;  %v770_v63 = vmax.f32 %v722_v55, 0.0 }
  0xae   : > { %v735_v48 = vmax.f32 %v687_v42, 0.0  ;;  %v747_v49 = vmax.f32 %v699_v43, 0.0 }
  0xb0   : > { %v1151_v50 = vpack.c.bf16 %v735_v48, %v734_v46  ;;  %v1181_v51 = vpack.c.bf16 %v747_v49, %v746_v47  ;;  %v572_v52 = vpop.f32.mrf.mxu2  ;;  %v602_v53 = vpop.f32.mrf.mxu3 }
  0xb1   : > { %v659_v56 = vmul.f32 %v1597_v30, %v572_v52  ;;  %v671_v57 = vmul.f32 %v1597_v30, %v602_v53  ;;  %v515_v58 = vpop.f32.mrf.mxu0  ;;  %v545_v59 = vpop.f32.mrf.mxu1 }
  0xb2   : > { %1152 = vst [vmem:[%s1621_s6] sm:$0xff] %v1151_v50   ;;  %v636_v2 = vmul.f32 %v1597_v30, %v515_v58  ;;  %v648_v3 = vmul.f32 %v1597_v30, %v545_v59 }
  0xb3   : > { %1273 = vst [vmem:[%s1621_s6 + $0x30] sm:$0xff] %v1181_v51   ;;  %v711_v60 = vadd.f32 %v1603_v32, %v659_v56  ;;  %v723_v61 = vadd.f32 %v1603_v32, %v671_v57 }
  0xb4   : > { %v688_v10 = vadd.f32 %v1603_v32, %v636_v2  ;;  %v700_v11 = vadd.f32 %v1603_v32, %v648_v3 }
  0xb5   : > { %v759_v0 = vmax.f32 %v711_v60, 0.0  ;;  %v771_v1 = vmax.f32 %v723_v61, 0.0 }
  0xb6   : > { %v736_v18 = vmax.f32 %v688_v10, 0.0  ;;  %v748_v19 = vmax.f32 %v700_v11, 0.0 }
  0xb7   : > { %v1211_v4 = vpack.c.bf16 %v759_v0, %v758_v62  ;;  %v1241_v5 = vpack.c.bf16 %v771_v1, %v770_v63 }
  0xb8   : > { %v575_v6 = vpop.f32.mrf.mxu2  ;;  %v605_v7 = vpop.f32.mrf.mxu3 }
  0xb9   : > { %1279 = vst [vmem:[%s1621_s6 + $0x60] sm:$0xff] %v1211_v4   ;;  %v517_v8 = vpop.f32.mrf.mxu0  ;;  %v547_v9 = vpop.f32.mrf.mxu1  ;;  %v660_v16 = vmul.f32 %v1597_v30, %v575_v6  ;;  %v672_v17 = vmul.f32 %v1597_v30, %v605_v7 }
  0xba   : > { %1285 = vst [vmem:[%s1621_s6 + $0x90] sm:$0xff] %v1241_v5   ;;  %v637_v12 = vmul.f32 %v1597_v30, %v517_v8  ;;  %v649_v13 = vmul.f32 %v1597_v30, %v547_v9 }
  0xbb   : > { %v712_v26 = vadd.f32 %v1603_v32, %v660_v16  ;;  %v724_v27 = vadd.f32 %v1603_v32, %v672_v17 }
  0xbc   : > { %v689_v14 = vadd.f32 %v1603_v32, %v637_v12  ;;  %v701_v15 = vadd.f32 %v1603_v32, %v649_v13 }
  0xbd   : > { %v760_v36 = vmax.f32 %v712_v26, 0.0  ;;  %v772_v37 = vmax.f32 %v724_v27, 0.0 }
  0xbe   : > { %v737_v20 = vmax.f32 %v689_v14, 0.0  ;;  %v749_v21 = vmax.f32 %v701_v15, 0.0 }
  0xc0   : > { %v1156_v22 = vpack.c.bf16 %v737_v20, %v736_v18  ;;  %v1186_v23 = vpack.c.bf16 %v749_v21, %v748_v19  ;;  %v577_v24 = vpop.f32.mrf.mxu2  ;;  %v607_v25 = vpop.f32.mrf.mxu3 }
  0xc1   : > { %v661_v28 = vmul.f32 %v1597_v30, %v577_v24  ;;  %v673_v29 = vmul.f32 %v1597_v30, %v607_v25  ;;  %v520_v31 = vpop.f32.mrf.mxu0  ;;  %v550_v33 = vpop.f32.mrf.mxu1 }
  0xc2   : > { %1268 = vst [vmem:[%s1621_s6 + $0x8] sm:$0xff] %v1156_v22   ;;  %v638_v40 = vmul.f32 %v1597_v30, %v520_v31  ;;  %v650_v41 = vmul.f32 %v1597_v30, %v550_v33 }
  0xc3   : > { %1274 = vst [vmem:[%s1621_s6 + $0x38] sm:$0xff] %v1186_v23   ;;  %v713_v34 = vadd.f32 %v1603_v32, %v661_v28  ;;  %v725_v35 = vadd.f32 %v1603_v32, %v673_v29 }
  0xc4   : > { %v690_v48 = vadd.f32 %v1603_v32, %v638_v40  ;;  %v702_v49 = vadd.f32 %v1603_v32, %v650_v41 }
  0xc5   : > { %v761_v38 = vmax.f32 %v713_v34, 0.0  ;;  %v773_v39 = vmax.f32 %v725_v35, 0.0 }
  0xc6   : > { %v738_v56 = vmax.f32 %v690_v48, 0.0  ;;  %v750_v57 = vmax.f32 %v702_v49, 0.0 }
  0xc7   : > { %v1216_v42 = vpack.c.bf16 %v761_v38, %v760_v36  ;;  %v1246_v43 = vpack.c.bf16 %v773_v39, %v772_v37 }
  0xc8   : > { %v580_v44 = vpop.f32.mrf.mxu2  ;;  %v610_v45 = vpop.f32.mrf.mxu3 }
  0xc9   : > { %1280 = vst [vmem:[%s1621_s6 + $0x68] sm:$0xff] %v1216_v42   ;;  %v522_v46 = vpop.f32.mrf.mxu0  ;;  %v552_v47 = vpop.f32.mrf.mxu1  ;;  %v662_v54 = vmul.f32 %v1597_v30, %v580_v44  ;;  %v674_v55 = vmul.f32 %v1597_v30, %v610_v45 }
  0xca   : > { %1286 = vst [vmem:[%s1621_s6 + $0x98] sm:$0xff] %v1246_v43   ;;  %v639_v50 = vmul.f32 %v1597_v30, %v522_v46  ;;  %v651_v51 = vmul.f32 %v1597_v30, %v552_v47 }
  0xcb   : > { %v714_v0 = vadd.f32 %v1603_v32, %v662_v54  ;;  %v726_v1 = vadd.f32 %v1603_v32, %v674_v55 }
  0xcc   : > { %v691_v52 = vadd.f32 %v1603_v32, %v639_v50  ;;  %v703_v53 = vadd.f32 %v1603_v32, %v651_v51 }
  0xcd   : > { %v762_v8 = vmax.f32 %v714_v0, 0.0  ;;  %v774_v9 = vmax.f32 %v726_v1, 0.0 }
  0xce   : > { %v739_v58 = vmax.f32 %v691_v52, 0.0  ;;  %v751_v59 = vmax.f32 %v703_v53, 0.0 }
  0xd0   : > { %v1161_v60 = vpack.c.bf16 %v739_v58, %v738_v56  ;;  %v1191_v61 = vpack.c.bf16 %v751_v59, %v750_v57  ;;  %v582_v62 = vpop.f32.mrf.mxu2  ;;  %v612_v63 = vpop.f32.mrf.mxu3 }
  0xd1   : > { %v663_v2 = vmul.f32 %v1597_v30, %v582_v62  ;;  %v675_v3 = vmul.f32 %v1597_v30, %v612_v63  ;;  %v525_v4 = vpop.f32.mrf.mxu0  ;;  %v555_v5 = vpop.f32.mrf.mxu1 }
  0xd2   : > { %1269 = vst [vmem:[%s1621_s6 + $0x10] sm:$0xff] %v1161_v60   ;;  %v640_v12 = vmul.f32 %v1597_v30, %v525_v4  ;;  %v652_v13 = vmul.f32 %v1597_v30, %v555_v5 }
  0xd3   : > { %1275 = vst [vmem:[%s1621_s6 + $0x40] sm:$0xff] %v1191_v61   ;;  %v715_v6 = vadd.f32 %v1603_v32, %v663_v2  ;;  %v727_v7 = vadd.f32 %v1603_v32, %v675_v3 }
  0xd4   : > { %v692_v20 = vadd.f32 %v1603_v32, %v640_v12  ;;  %v704_v21 = vadd.f32 %v1603_v32, %v652_v13 }
  0xd5   : > { %v763_v10 = vmax.f32 %v715_v6, 0.0  ;;  %v775_v11 = vmax.f32 %v727_v7, 0.0 }
  0xd6   : > { %v740_v28 = vmax.f32 %v692_v20, 0.0  ;;  %v752_v29 = vmax.f32 %v704_v21, 0.0 }
  0xd7   : > { %v1221_v14 = vpack.c.bf16 %v763_v10, %v762_v8  ;;  %v1251_v15 = vpack.c.bf16 %v775_v11, %v774_v9 }
  0xd8   : > { %v585_v16 = vpop.f32.mrf.mxu2  ;;  %v615_v17 = vpop.f32.mrf.mxu3 }
  0xd9   : > { %1281 = vst [vmem:[%s1621_s6 + $0x70] sm:$0xff] %v1221_v14   ;;  %v527_v18 = vpop.f32.mrf.mxu0  ;;  %v557_v19 = vpop.f32.mrf.mxu1  ;;  %v664_v26 = vmul.f32 %v1597_v30, %v585_v16  ;;  %v676_v27 = vmul.f32 %v1597_v30, %v615_v17 }
  0xda   : > { %1287 = vst [vmem:[%s1621_s6 + $0xa0] sm:$0xff] %v1251_v15   ;;  %v641_v22 = vmul.f32 %v1597_v30, %v527_v18  ;;  %v653_v23 = vmul.f32 %v1597_v30, %v557_v19 }
  0xdb   : > { %v716_v38 = vadd.f32 %v1603_v32, %v664_v26  ;;  %v728_v39 = vadd.f32 %v1603_v32, %v676_v27 }
  0xdc   : > { %v693_v24 = vadd.f32 %v1603_v32, %v641_v22  ;;  %v705_v25 = vadd.f32 %v1603_v32, %v653_v23 }
  0xdd   : > { %v764_v46 = vmax.f32 %v716_v38, 0.0  ;;  %v776_v47 = vmax.f32 %v728_v39, 0.0 }
  0xde   : > { %v741_v31 = vmax.f32 %v693_v24, 0.0  ;;  %v753_v33 = vmax.f32 %v705_v25, 0.0 }
  0xe0   : > { %v1166_v34 = vpack.c.bf16 %v741_v31, %v740_v28  ;;  %v1196_v35 = vpack.c.bf16 %v753_v33, %v752_v29  ;;  %v587_v36 = vpop.f32.mrf.mxu2  ;;  %v617_v37 = vpop.f32.mrf.mxu3 }
  0xe1   : > { %v665_v40 = vmul.f32 %v1597_v30, %v587_v36  ;;  %v677_v41 = vmul.f32 %v1597_v30, %v617_v37  ;;  %v530_v42 = vpop.f32.mrf.mxu0  ;;  %v560_v43 = vpop.f32.mrf.mxu1 }
  0xe2   : > { %1270 = vst [vmem:[%s1621_s6 + $0x18] sm:$0xff] %v1166_v34   ;;  %v642_v50 = vmul.f32 %v1597_v30, %v530_v42  ;;  %v654_v51 = vmul.f32 %v1597_v30, %v560_v43 }
  0xe3   : > { %1276 = vst [vmem:[%s1621_s6 + $0x48] sm:$0xff] %v1196_v35   ;;  %v717_v44 = vadd.f32 %v1603_v32, %v665_v40  ;;  %v729_v45 = vadd.f32 %v1603_v32, %v677_v41 }
  0xe4   : > { %v694_v58 = vadd.f32 %v1603_v32, %v642_v50  ;;  %v706_v59 = vadd.f32 %v1603_v32, %v654_v51 }
  0xe5   : > { %v765_v48 = vmax.f32 %v717_v44, 0.0  ;;  %v777_v49 = vmax.f32 %v729_v45, 0.0 }
  0xe6   : > { %v742_v2 = vmax.f32 %v694_v58, 0.0  ;;  %v754_v3 = vmax.f32 %v706_v59, 0.0 }
  0xe7   : > { %v1226_v52 = vpack.c.bf16 %v765_v48, %v764_v46  ;;  %v1256_v53 = vpack.c.bf16 %v777_v49, %v776_v47 }
  0xe8   : > { %v590_v54 = vpop.f32.mrf.mxu2  ;;  %v620_v55 = vpop.f32.mrf.mxu3 }
  0xe9   : > { %1282 = vst [vmem:[%s1621_s6 + $0x78] sm:$0xff] %v1226_v52   ;;  %v532_v56 = vpop.f32.mrf.mxu0  ;;  %v562_v57 = vpop.f32.mrf.mxu1  ;;  %v666_v0 = vmul.f32 %v1597_v30, %v590_v54  ;;  %v678_v1 = vmul.f32 %v1597_v30, %v620_v55 }
  0xea   : > { %1288 = vst [vmem:[%s1621_s6 + $0xa8] sm:$0xff] %v1256_v53   ;;  %v643_v60 = vmul.f32 %v1597_v30, %v532_v56  ;;  %v655_v61 = vmul.f32 %v1597_v30, %v562_v57 }
  0xeb   : > { %v718_v10 = vadd.f32 %v1603_v32, %v666_v0  ;;  %v730_v11 = vadd.f32 %v1603_v32, %v678_v1 }
  0xec   : > { %v695_v62 = vadd.f32 %v1603_v32, %v643_v60  ;;  %v707_v63 = vadd.f32 %v1603_v32, %v655_v61 }
  0xed   : > { %v766_v18 = vmax.f32 %v718_v10, 0.0  ;;  %v778_v19 = vmax.f32 %v730_v11, 0.0 }
  0xee   : > { %v743_v4 = vmax.f32 %v695_v62, 0.0  ;;  %v755_v5 = vmax.f32 %v707_v63, 0.0 }
  0xf0   : > { %v1171_v6 = vpack.c.bf16 %v743_v4, %v742_v2  ;;  %v1201_v7 = vpack.c.bf16 %v755_v5, %v754_v3  ;;  %v592_v8 = vpop.f32.mrf.mxu2  ;;  %v622_v9 = vpop.f32.mrf.mxu3 }
  0xf1   : > { %v667_v12 = vmul.f32 %v1597_v30, %v592_v8  ;;  %v679_v13 = vmul.f32 %v1597_v30, %v622_v9  ;;  %v535_v14 = vpop.f32.mrf.mxu0  ;;  %v565_v15 = vpop.f32.mrf.mxu1 }
  0xf2   : > { %1271 = vst [vmem:[%s1621_s6 + $0x20] sm:$0xff] %v1171_v6   ;;  %v644_v22 = vmul.f32 %v1597_v30, %v535_v14  ;;  %v656_v23 = vmul.f32 %v1597_v30, %v565_v15 }
  0xf3   : > { %1277 = vst [vmem:[%s1621_s6 + $0x50] sm:$0xff] %v1201_v7   ;;  %v719_v16 = vadd.f32 %v1603_v32, %v667_v12  ;;  %v731_v17 = vadd.f32 %v1603_v32, %v679_v13 }
  0xf4   : > { %v696_v31 = vadd.f32 %v1603_v32, %v644_v22  ;;  %v708_v33 = vadd.f32 %v1603_v32, %v656_v23 }
  0xf5   : > { %v767_v20 = vmax.f32 %v719_v16, 0.0  ;;  %v779_v21 = vmax.f32 %v731_v17, 0.0 }
  0xf6   : > { %v744_v40 = vmax.f32 %v696_v31, 0.0  ;;  %v756_v41 = vmax.f32 %v708_v33, 0.0 }
  0xf7   : > { %v1231_v24 = vpack.c.bf16 %v767_v20, %v766_v18  ;;  %v1261_v25 = vpack.c.bf16 %v779_v21, %v778_v19 }
  0xf8   : > { %v595_v26 = vpop.f32.mrf.mxu2  ;;  %v625_v27 = vpop.f32.mrf.mxu3 }
  0xf9   : > { %1283 = vst [vmem:[%s1621_s6 + $0x80] sm:$0xff] %v1231_v24   ;;  %v537_v28 = vpop.f32.mrf.mxu0  ;;  %v567_v29 = vpop.f32.mrf.mxu1  ;;  %v668_v38 = vmul.f32 %v1597_v30, %v595_v26  ;;  %v680_v39 = vmul.f32 %v1597_v30, %v625_v27 }
  0xfa   : > { %1289 = vst [vmem:[%s1621_s6 + $0xb0] sm:$0xff] %v1261_v25   ;;  %v645_v34 = vmul.f32 %v1597_v30, %v537_v28  ;;  %v657_v35 = vmul.f32 %v1597_v30, %v567_v29 }
  0xfb   : > { %v720_v48 = vadd.f32 %v1603_v32, %v668_v38  ;;  %v732_v49 = vadd.f32 %v1603_v32, %v680_v39 }
  0xfc   : > { %v697_v36 = vadd.f32 %v1603_v32, %v645_v34  ;;  %v709_v37 = vadd.f32 %v1603_v32, %v657_v35 }
  0xfd   : > { %v768_v54 = vmax.f32 %v720_v48, 0.0  ;;  %v780_v55 = vmax.f32 %v732_v49, 0.0 }
  0xfe   : > { %v745_v42 = vmax.f32 %v697_v36, 0.0  ;;  %v757_v43 = vmax.f32 %v709_v37, 0.0 }
 0x100   : > { %v1176_v44 = vpack.c.bf16 %v745_v42, %v744_v40  ;;  %v1206_v45 = vpack.c.bf16 %v757_v43, %v756_v41  ;;  %v597_v46 = vpop.f32.mrf.mxu2  ;;  %v627_v47 = vpop.f32.mrf.mxu3 }
 0x101   : > { %v669_v50 = vmul.f32 %v1597_v30, %v597_v46  ;;  %v681_v51 = vmul.f32 %v1597_v30, %v627_v47 }
 0x102   : > { %1272 = vst [vmem:[%s1621_s6 + $0x28] sm:$0xff] %v1176_v44  }
 0x103   : > { %1278 = vst [vmem:[%s1621_s6 + $0x58] sm:$0xff] %v1206_v45   ;;  %v721_v52 = vadd.f32 %v1603_v32, %v669_v50  ;;  %v733_v53 = vadd.f32 %v1603_v32, %v681_v51 }
 0x105   : > { %v769_v56 = vmax.f32 %v721_v52, 0.0  ;;  %v781_v30 = vmax.f32 %v733_v53, 0.0 }
 0x107   : > { %v1236_v57 = vpack.c.bf16 %v769_v56, %v768_v54  ;;  %v1266_v58 = vpack.c.bf16 %v781_v30, %v780_v55 }
 0x109   : > { %1284 = vst [vmem:[%s1621_s6 + $0x88] sm:$0xff] %v1236_v57  }
 0x10a   : > { %1290 = vst [vmem:[%s1621_s6 + $0xb8] sm:$0xff] %v1266_v58  }
 0x10b   : > { %1392 = shalt.err (!%p1389_p5)
}
 0x10c   : > { %s1445_s30 = smov 64   ;;  %s1446_s5 = smov 4  }
 0x10d   : > { %1306 = dma.vmem_to_hbm [thread:$0]  (%p1512_p4), %s894_s10, 3072, %s896_s11, %s879_s12, %s1445_s30, %s1445_s30, %s1446_s5  }
 0x10e PF: > { %p1312_p6 = scmp.ge.s32.totalorder %s1443_s20, 2  ;;  %s910_s6 = sand.u32 1, %s1423_s15  }
 0x10f   : > { %s911_s7 = scalar_lea.sflag [#allocation3], %s910_s6 }
 0x110   : > { %p1309_p7 = pnand %p1312_p6, %p1519_p8 }
 0x112   : > { %p1310_p9 = pneg %p1309_p7 }
 0x114   : > { %1418 = dma.done.wait (%p1310_p9), %s911_s7, 3072  }
 0x115   : > { %1420 = vsyncadd (%p1310_p9), %s911_s7, 4294964224  ;;  %s17_s20 = sadd.s32 1, %s1443_s20   ;;  %s1775_s15 = smov %s1427_s16 }
 0x116   : > { %p14_p10 = scmp.ge.s32.totalorder %s17_s20, 4   ;;  %s1776_s16 = smov %s1431_s17 }
 0x117   : > { %s1777_s17 = smov %s1525_s28  ;;  %s1778_s18 = smov %s1439_s19 }
 0x118   : > { %s1779_s19 = smov %s1781_s23  ;;  %16 = sbr.rel (!%p14_p10) target bundleno = 4 (0x4), region = 71 }
 0x11d   :  { %917 = vsyncpa [#allocation3], 1 }
 0x11e   :  { %919 = vsyncpa [#allocation3 + $0x1], 1 }

</bundles_post_ra>
